<compile_context>
chip_gen: v6e
topology: v6e:2x2x1
jax: 0.10.0
libtpu: 0.0.40
codegen_flags: <defaults>
</compile_context>

<pallas_src>
import jax
import jax.numpy as jnp
from jax import lax
from jax.experimental import pallas as pl
from jax.experimental.pallas import tpu as pltpu


def basic_block_kernel(x_ref, wt1_ref, b1_ref, wt2_ref, b2_ref, out_ref, halo):
    # x_ref  : (imgs, H, WC)        f32  input slab(s); also the residual branch
    # wt*_ref: (3, WC, WC)          bf16 block-Toeplitz conv weights (BN scale folded in)
    # b*_ref : (1, WC)              f32  folded BN shift, tiled across W
    # out_ref: (imgs, H, WC)        f32  output slab(s)
    # halo   : (imgs*(H+2)+2, WC)   bf16 stacked per-image padded slabs
    #                                    (2 trailing rows so the dy=1,2 slices stay in bounds)
    imgs, H, WC = out_ref.shape
    P = H + 2              # padded rows per image
    M = imgs * P           # matmul M dimension

    # Zero all padding rows every step (scratch persists across grid steps / cores).
    zrow = jnp.zeros((1, WC), halo.dtype)
    for i in range(imgs):
        halo[pl.ds(i * P, 1), :] = zrow                 # top pad of image i
        halo[pl.ds(i * P + H + 1, 1), :] = zrow         # bottom pad of image i
    halo[pl.ds(M, 2), :] = jnp.zeros((2, WC), halo.dtype)

    def conv3x3(wt_ref):
        # 3 MXU matmuls (one per dy tap): bf16 operands, f32 accumulation, M rows each.
        # out[m] = sum_dy halo[m+dy] @ Wt[dy]; rows m = i*P + r (r<H) are the valid ones.
        return sum(
            jnp.dot(halo[pl.ds(dy, M), :], wt_ref[dy],
                    preferred_element_type=jnp.float32)
            for dy in range(3))

    x = x_ref[...]                                      # (imgs, H, WC) f32

    # ---- conv1 -> bn1 -> relu ----
    for i in range(imgs):
        halo[pl.ds(i * P + 1, H), :] = x[i].astype(halo.dtype)
    a1 = jnp.maximum(conv3x3(wt1_ref) + b1_ref[...], 0.0)          # (M, WC) f32

    # ---- conv2 -> bn2 -> + identity -> relu ----
    for i in range(imgs):
        halo[pl.ds(i * P + 1, H), :] = a1[i * P:i * P + H].astype(halo.dtype)
    a2 = conv3x3(wt2_ref) + b2_ref[...]                            # (M, WC) f32

    for i in range(imgs):
        out_ref[i] = jnp.maximum(a2[i * P:i * P + H] + x[i], 0.0).astype(out_ref.dtype)


def _toeplitz_weight(w_hwio, W, scale):
    """Fold the 3 dx taps, SAME padding along W, and the BN scale (per output channel)
    into one (W*Cin, W*Cout) bf16 matrix per dy tap."""
    Cin, Cout = w_hwio.shape[2], w_hwio.shape[3]
    w_scaled = w_hwio * scale                            # fold BN scale (f32, exact)
    dx = jnp.arange(3)[:, None, None]
    p = jnp.arange(W)[None, :, None]                     # input column
    q = jnp.arange(W)[None, None, :]                     # output column
    mask = (p == q + dx - 1).astype(w_hwio.dtype)        # (3, W, W) SAME-padding Toeplitz
    wt = jnp.einsum('dpw,ydio->ypiwo', mask, w_scaled)   # (3, W, Cin, W, Cout)
    return wt.reshape(3, W * Cin, W * Cout).astype(jnp.bfloat16)


def _pick_num_steps(N, P, max_rows=1024):
    """Smallest grid that keeps >= 2 parallel steps (v7x megacore) while stacking as many
    images per step as VMEM comfortably allows."""
    if N <= 1:
        return 1
    for d in range(2, N + 1):
        if N % d == 0 and (N // d) * P <= max_rows:
            return d
    return N


@jax.jit
def basic_block_slab(x_slab, w1, g1, be1, m1, v1, w2, g2, be2, m2, v2, eps=1e-5):
    """BasicBlock forward on the lane-dense slab layout (N, H, W*C), channel-fastest.
    Use this entry point when chaining blocks to avoid NCHW<->slab transposes."""
    N, H, WC = x_slab.shape
    C = g1.shape[0]
    W = WC // C

    # Fold BatchNorm (eval mode) into per-channel scale / shift; the scale goes into the
    # Toeplitz weight columns, the shift stays a (1, WC) kernel input (f32).
    def fold(g, be, m, v):
        s = g * lax.rsqrt(v + eps)
        b = be - m * s
        return s, jnp.tile(b, W).reshape(1, WC)

    s1, b1 = fold(g1, be1, m1, v1)
    s2, b2 = fold(g2, be2, m2, v2)
    wt1 = _toeplitz_weight(w1, W, s1)    # (3, W*C, W*C) bf16, scale folded
    wt2 = _toeplitz_weight(w2, W, s2)

    P = H + 2
    num_steps = _pick_num_steps(N, P)
    imgs = N // num_steps
    M = imgs * P

    flops = 2 * 2 * 3 * N * P * WC * WC          # 2 convs x 3 dy taps x (M, WC)x(WC, WC)
    bytes_accessed = (2 * N * H * WC * 4         # x in + out (f32)
                      + 2 * 3 * WC * WC * 2      # two bf16 Toeplitz weights
                      + 2 * WC * 4)              # BN shifts

    out_slab = pl.pallas_call(
        basic_block_kernel,
        out_shape=jax.ShapeDtypeStruct((N, H, WC), x_slab.dtype),
        grid_spec=pltpu.PrefetchScalarGridSpec(
            num_scalar_prefetch=0,
            grid=(num_steps,),
            in_specs=[
                pl.BlockSpec((imgs, H, WC), lambda n: (n, 0, 0)),   # x slabs (+ residual)
                pl.BlockSpec((3, WC, WC), lambda n: (0, 0, 0)),     # conv1 Toeplitz weight
                pl.BlockSpec((1, WC), lambda n: (0, 0)),            # bn1 shift
                pl.BlockSpec((3, WC, WC), lambda n: (0, 0, 0)),     # conv2 Toeplitz weight
                pl.BlockSpec((1, WC), lambda n: (0, 0)),            # bn2 shift
            ],
            out_specs=pl.BlockSpec((imgs, H, WC), lambda n: (n, 0, 0)),
            scratch_shapes=[pltpu.VMEM((M + 2, WC), jnp.bfloat16)],
        ),
        compiler_params=pltpu.CompilerParams(
            dimension_semantics=("parallel",)),
        cost_estimate=pl.CostEstimate(flops=flops, transcendentals=0,
                                      bytes_accessed=bytes_accessed),
    )(x_slab, wt1, b1, wt2, b2)
    return out_slab


@jax.jit
def basic_block(x_nchw, w1, g1, be1, m1, v1, w2, g2, be2, m2, v2, eps=1e-5):
    # NCHW convenience wrapper (PyTorch convention) around the slab kernel.
    # TODO(synk): when chaining blocks, stay in (N, H, W*C) slab layout and call
    # basic_block_slab directly — these transposes are full extra HBM passes.
    N, C, H, W = x_nchw.shape
    x_slab = jnp.transpose(x_nchw, (0, 2, 3, 1)).reshape(N, H, W * C)
    out_slab = basic_block_slab(x_slab, w1, g1, be1, m1, v1, w2, g2, be2, m2, v2, eps)
    out = out_slab.reshape(N, H, W, C)
    return jnp.transpose(out, (0, 3, 1, 2))


def reference_forward(x_nchw, w1, g1, be1, m1, v1, w2, g2, be2, m2, v2,
                      eps=1e-5, conv_dtype=jnp.float32):
    """Pure-JAX reference. With conv_dtype=f32 this is the PyTorch eval-mode forward;
    with conv_dtype=bf16 it mirrors the kernel's MXU math (BN scale folded into the
    weight BEFORE the bf16 cast, bf16 activations at the conv, f32 accumulation)."""
    x = jnp.transpose(x_nchw, (0, 2, 3, 1))
    dn = ("NHWC", "HWIO", "NHWC")
    s1 = g1 / jnp.sqrt(v1 + eps); b1 = be1 - m1 * s1
    s2 = g2 / jnp.sqrt(v2 + eps); b2 = be2 - m2 * s2

    def conv(inp, w, s):
        return lax.conv_general_dilated(
            inp.astype(conv_dtype), (w * s).astype(conv_dtype), (1, 1), "SAME",
            dimension_numbers=dn, preferred_element_type=jnp.float32)

    y = jnp.maximum(conv(x, w1, s1) + b1, 0.0)
    y = conv(y, w2, s2) + b2 + x
    y = jnp.maximum(y, 0.0)
    return jnp.transpose(y, (0, 3, 1, 2))


if __name__ == "__main__":
    key = jax.random.PRNGKey(0)
    N, C, H, W = 2, 8, 16, 16  # inplanes == planes, stride=1, downsample=None; W*C = 128

    keys = jax.random.split(key, 8)
    x = jax.random.normal(keys[0], (N, C, H, W), jnp.float32)

    # Conv weights in HWIO layout (PyTorch OIHW weights transposed to (kh, kw, in, out)).
    w1 = jax.random.normal(keys[1], (3, 3, C, C), jnp.float32) * 0.1
    w2 = jax.random.normal(keys[2], (3, 3, C, C), jnp.float32) * 0.1

    # BatchNorm parameters (deterministic, non-trivial).
    g1 = 1.0 + 0.1 * jax.random.normal(keys[3], (C,), jnp.float32)
    be1 = 0.1 * jax.random.normal(keys[4], (C,), jnp.float32)
    m1 = 0.05 * jax.random.normal(keys[5], (C,), jnp.float32)
    v1 = jnp.abs(1.0 + 0.1 * jax.random.normal(keys[6], (C,), jnp.float32))
    g2 = jnp.ones((C,), jnp.float32) * 0.9
    be2 = jnp.full((C,), 0.05, jnp.float32)
    m2 = jnp.zeros((C,), jnp.float32)
    v2 = jnp.ones((C,), jnp.float32) * 1.1

    out = basic_block(x, w1, g1, be1, m1, v1, w2, g2, be2, m2, v2)
    out = jax.block_until_ready(out)
    assert out.shape == (N, C, H, W)

    # Primary check: same math as the kernel (bf16 MXU operands, scale folded pre-cast,
    # f32 accumulation / epilogue).
    ref_bf16 = reference_forward(x, w1, g1, be1, m1, v1, w2, g2, be2, m2, v2,
                                 conv_dtype=jnp.bfloat16)
    assert jnp.allclose(out, ref_bf16, atol=2e-3, rtol=2e-3), "mismatch vs bf16-operand reference"

    # Sanity check vs. the full-f32 PyTorch-equivalent forward; the gap is bounded by
    # bf16 operand rounding on the MXU path.
    ref_f32 = reference_forward(x, w1, g1, be1, m1, v1, w2, g2, be2, m2, v2,
                                conv_dtype=jnp.float32)
    assert jnp.allclose(out, ref_f32, atol=2e-2, rtol=2e-2), "mismatch vs f32 reference"

    print("KERNEL_OK")
</pallas_src>

<mosaic_0001>
module attributes {stable_mosaic.version = 11 : i64} {
  func.func @basic_block_kernel(%arg0: i32, %arg1: memref<1x16x128xf32, #tpu.memory_space<vmem>>, %arg2: memref<3x128x128xbf16, #tpu.memory_space<vmem>>, %arg3: memref<1x128xf32, #tpu.memory_space<vmem>>, %arg4: memref<3x128x128xbf16, #tpu.memory_space<vmem>>, %arg5: memref<1x128xf32, #tpu.memory_space<vmem>>, %arg6: memref<1x16x128xf32, #tpu.memory_space<vmem>>, %arg7: memref<20x128xbf16, #tpu.memory_space<vmem>>) attributes {dimension_semantics = [#tpu.dimension_semantics<parallel>], iteration_bounds = array<i64: 2>, scalar_prefetch = 0 : i64, scratch_operands = 1 : i64, tpu.core_type = #tpu.core_type<tc>, window_params = [{transform_indices = @transform_0, window_bounds = array<i64: 1, 16, 128>}, {pipeline_mode = #tpu.pipeline_mode<synchronous>, transform_indices = @transform_1, window_bounds = array<i64: 3, 128, 128>}, {pipeline_mode = #tpu.pipeline_mode<synchronous>, transform_indices = @transform_2, window_bounds = array<i64: 1, 128>}, {pipeline_mode = #tpu.pipeline_mode<synchronous>, transform_indices = @transform_3, window_bounds = array<i64: 3, 128, 128>}, {pipeline_mode = #tpu.pipeline_mode<synchronous>, transform_indices = @transform_4, window_bounds = array<i64: 1, 128>}, {transform_indices = @transform_5, window_bounds = array<i64: 1, 16, 128>}]} {
    %cst = arith.constant 0.000000e+00 : bf16
    %0 = vector.broadcast %cst : bf16 to vector<1x128xbf16>
    %c0 = arith.constant 0 : index
    %c0_0 = arith.constant 0 : index
    %1 = vector.load %arg7[%c0, %c0_0] : memref<20x128xbf16, #tpu.memory_space<vmem>>, vector<1x128xbf16>
    tpu.vector_store %arg7[%c0, %c0_0], %0 {strides = array<i32>} : memref<20x128xbf16, #tpu.memory_space<vmem>>, vector<1x128xbf16>,
    %c17 = arith.constant 17 : index
    %c0_1 = arith.constant 0 : index
    %2 = vector.load %arg7[%c17, %c0_1] : memref<20x128xbf16, #tpu.memory_space<vmem>>, vector<1x128xbf16>
    tpu.vector_store %arg7[%c17, %c0_1], %0 {strides = array<i32>} : memref<20x128xbf16, #tpu.memory_space<vmem>>, vector<1x128xbf16>,
    %cst_2 = arith.constant 0.000000e+00 : bf16
    %3 = vector.broadcast %cst_2 : bf16 to vector<2x128xbf16>
    %c18 = arith.constant 18 : index
    %c0_3 = arith.constant 0 : index
    %4 = vector.load %arg7[%c18, %c0_3] : memref<20x128xbf16, #tpu.memory_space<vmem>>, vector<2x128xbf16>
    tpu.vector_store %arg7[%c18, %c0_3], %3 {strides = array<i32>} : memref<20x128xbf16, #tpu.memory_space<vmem>>, vector<2x128xbf16>,
    %c0_4 = arith.constant 0 : index
    %c0_5 = arith.constant 0 : index
    %c0_6 = arith.constant 0 : index
    %5 = vector.load %arg1[%c0_4, %c0_5, %c0_6] : memref<1x16x128xf32, #tpu.memory_space<vmem>>, vector<1x16x128xf32>
    %6 = vector.shape_cast %5 : vector<1x16x128xf32> to vector<16x128xf32>
    %7 = arith.truncf %6 : vector<16x128xf32> to vector<16x128xbf16>
    %c1 = arith.constant 1 : index
    %c0_7 = arith.constant 0 : index
    %8 = vector.load %arg7[%c1, %c0_7] : memref<20x128xbf16, #tpu.memory_space<vmem>>, vector<16x128xbf16>
    tpu.vector_store %arg7[%c1, %c0_7], %7 {strides = array<i32>} : memref<20x128xbf16, #tpu.memory_space<vmem>>, vector<16x128xbf16>,
    %c0_8 = arith.constant 0 : index
    %c0_9 = arith.constant 0 : index
    %9 = vector.load %arg7[%c0_8, %c0_9] : memref<20x128xbf16, #tpu.memory_space<vmem>>, vector<18x128xbf16>
    %c0_10 = arith.constant 0 : index
    %c0_11 = arith.constant 0 : index
    %c0_12 = arith.constant 0 : index
    %10 = vector.load %arg2[%c0_10, %c0_11, %c0_12] : memref<3x128x128xbf16, #tpu.memory_space<vmem>>, vector<1x128x128xbf16>
    %11 = vector.shape_cast %10 : vector<1x128x128xbf16> to vector<128x128xbf16>
    %cst_13 = arith.constant dense<0.000000e+00> : vector<18x128xf32>
    %12 = tpu.matmul %9, %11, %cst_13 {dimension_numbers = #tpu.dot_dimension_numbers<[1], [0], [0], [1], [0, 0, 1, 1], [], []>} : vector<18x128xbf16>, vector<128x128xbf16>, vector<18x128xf32> -> vector<18x128xf32>
    %cst_14 = arith.constant 0.000000e+00 : f32
    %13 = vector.broadcast %cst_14 : f32 to vector<18x128xf32>
    %14 = arith.addf %13, %12 : vector<18x128xf32>
    %c1_15 = arith.constant 1 : index
    %c0_16 = arith.constant 0 : index
    %15 = vector.load %arg7[%c1_15, %c0_16] : memref<20x128xbf16, #tpu.memory_space<vmem>>, vector<18x128xbf16>
    %c1_17 = arith.constant 1 : index
    %c0_18 = arith.constant 0 : index
    %c0_19 = arith.constant 0 : index
    %16 = vector.load %arg2[%c1_17, %c0_18, %c0_19] : memref<3x128x128xbf16, #tpu.memory_space<vmem>>, vector<1x128x128xbf16>
    %17 = vector.shape_cast %16 : vector<1x128x128xbf16> to vector<128x128xbf16>
    %cst_20 = arith.constant dense<0.000000e+00> : vector<18x128xf32>
    %18 = tpu.matmul %15, %17, %cst_20 {dimension_numbers = #tpu.dot_dimension_numbers<[1], [0], [0], [1], [0, 0, 1, 1], [], []>} : vector<18x128xbf16>, vector<128x128xbf16>, vector<18x128xf32> -> vector<18x128xf32>
    %19 = arith.addf %14, %18 : vector<18x128xf32>
    %c2 = arith.constant 2 : index
    %c0_21 = arith.constant 0 : index
    %20 = vector.load %arg7[%c2, %c0_21] : memref<20x128xbf16, #tpu.memory_space<vmem>>, vector<18x128xbf16>
    %c2_22 = arith.constant 2 : index
    %c0_23 = arith.constant 0 : index
    %c0_24 = arith.constant 0 : index
    %21 = vector.load %arg2[%c2_22, %c0_23, %c0_24] : memref<3x128x128xbf16, #tpu.memory_space<vmem>>, vector<1x128x128xbf16>
    %22 = vector.shape_cast %21 : vector<1x128x128xbf16> to vector<128x128xbf16>
    %cst_25 = arith.constant dense<0.000000e+00> : vector<18x128xf32>
    %23 = tpu.matmul %20, %22, %cst_25 {dimension_numbers = #tpu.dot_dimension_numbers<[1], [0], [0], [1], [0, 0, 1, 1], [], []>} : vector<18x128xbf16>, vector<128x128xbf16>, vector<18x128xf32> -> vector<18x128xf32>
    %24 = arith.addf %19, %23 : vector<18x128xf32>
    %c0_26 = arith.constant 0 : index
    %c0_27 = arith.constant 0 : index
    %25 = vector.load %arg3[%c0_26, %c0_27] : memref<1x128xf32, #tpu.memory_space<vmem>>, vector<1x128xf32>
    %26 = vector.broadcast %25 : vector<1x128xf32> to vector<18x128xf32>
    %27 = arith.addf %24, %26 : vector<18x128xf32>
    %cst_28 = arith.constant 0.000000e+00 : f32
    %28 = vector.broadcast %cst_28 : f32 to vector<18x128xf32>
    %29 = arith.maximumf %27, %28 : vector<18x128xf32>
    %30 = vector.extract_strided_slice %29 {offsets = [0, 0], sizes = [16, 128], strides = [1, 1]} : vector<18x128xf32> to vector<16x128xf32>
    %31 = arith.truncf %30 : vector<16x128xf32> to vector<16x128xbf16>
    %c1_29 = arith.constant 1 : index
    %c0_30 = arith.constant 0 : index
    %32 = vector.load %arg7[%c1_29, %c0_30] : memref<20x128xbf16, #tpu.memory_space<vmem>>, vector<16x128xbf16>
    tpu.vector_store %arg7[%c1_29, %c0_30], %31 {strides = array<i32>} : memref<20x128xbf16, #tpu.memory_space<vmem>>, vector<16x128xbf16>,
    %c0_31 = arith.constant 0 : index
    %c0_32 = arith.constant 0 : index
    %33 = vector.load %arg7[%c0_31, %c0_32] : memref<20x128xbf16, #tpu.memory_space<vmem>>, vector<18x128xbf16>
    %c0_33 = arith.constant 0 : index
    %c0_34 = arith.constant 0 : index
    %c0_35 = arith.constant 0 : index
    %34 = vector.load %arg4[%c0_33, %c0_34, %c0_35] : memref<3x128x128xbf16, #tpu.memory_space<vmem>>, vector<1x128x128xbf16>
    %35 = vector.shape_cast %34 : vector<1x128x128xbf16> to vector<128x128xbf16>
    %cst_36 = arith.constant dense<0.000000e+00> : vector<18x128xf32>
    %36 = tpu.matmul %33, %35, %cst_36 {dimension_numbers = #tpu.dot_dimension_numbers<[1], [0], [0], [1], [0, 0, 1, 1], [], []>} : vector<18x128xbf16>, vector<128x128xbf16>, vector<18x128xf32> -> vector<18x128xf32>
    %cst_37 = arith.constant 0.000000e+00 : f32
    %37 = vector.broadcast %cst_37 : f32 to vector<18x128xf32>
    %38 = arith.addf %37, %36 : vector<18x128xf32>
    %c1_38 = arith.constant 1 : index
    %c0_39 = arith.constant 0 : index
    %39 = vector.load %arg7[%c1_38, %c0_39] : memref<20x128xbf16, #tpu.memory_space<vmem>>, vector<18x128xbf16>
    %c1_40 = arith.constant 1 : index
    %c0_41 = arith.constant 0 : index
    %c0_42 = arith.constant 0 : index
    %40 = vector.load %arg4[%c1_40, %c0_41, %c0_42] : memref<3x128x128xbf16, #tpu.memory_space<vmem>>, vector<1x128x128xbf16>
    %41 = vector.shape_cast %40 : vector<1x128x128xbf16> to vector<128x128xbf16>
    %cst_43 = arith.constant dense<0.000000e+00> : vector<18x128xf32>
    %42 = tpu.matmul %39, %41, %cst_43 {dimension_numbers = #tpu.dot_dimension_numbers<[1], [0], [0], [1], [0, 0, 1, 1], [], []>} : vector<18x128xbf16>, vector<128x128xbf16>, vector<18x128xf32> -> vector<18x128xf32>
    %43 = arith.addf %38, %42 : vector<18x128xf32>
    %c2_44 = arith.constant 2 : index
    %c0_45 = arith.constant 0 : index
    %44 = vector.load %arg7[%c2_44, %c0_45] : memref<20x128xbf16, #tpu.memory_space<vmem>>, vector<18x128xbf16>
    %c2_46 = arith.constant 2 : index
    %c0_47 = arith.constant 0 : index
    %c0_48 = arith.constant 0 : index
    %45 = vector.load %arg4[%c2_46, %c0_47, %c0_48] : memref<3x128x128xbf16, #tpu.memory_space<vmem>>, vector<1x128x128xbf16>
    %46 = vector.shape_cast %45 : vector<1x128x128xbf16> to vector<128x128xbf16>
    %cst_49 = arith.constant dense<0.000000e+00> : vector<18x128xf32>
    %47 = tpu.matmul %44, %46, %cst_49 {dimension_numbers = #tpu.dot_dimension_numbers<[1], [0], [0], [1], [0, 0, 1, 1], [], []>} : vector<18x128xbf16>, vector<128x128xbf16>, vector<18x128xf32> -> vector<18x128xf32>
    %48 = arith.addf %43, %47 : vector<18x128xf32>
    %c0_50 = arith.constant 0 : index
    %c0_51 = arith.constant 0 : index
    %49 = vector.load %arg5[%c0_50, %c0_51] : memref<1x128xf32, #tpu.memory_space<vmem>>, vector<1x128xf32>
    %50 = vector.broadcast %49 : vector<1x128xf32> to vector<18x128xf32>
    %51 = arith.addf %48, %50 : vector<18x128xf32>
    %52 = vector.extract_strided_slice %51 {offsets = [0, 0], sizes = [16, 128], strides = [1, 1]} : vector<18x128xf32> to vector<16x128xf32>
    %53 = vector.shape_cast %5 : vector<1x16x128xf32> to vector<16x128xf32>
    %54 = arith.addf %52, %53 : vector<16x128xf32>
    %cst_52 = arith.constant 0.000000e+00 : f32
    %55 = vector.broadcast %cst_52 : f32 to vector<16x128xf32>
    %56 = arith.maximumf %54, %55 : vector<16x128xf32>
    %c0_53 = arith.constant 0 : index
    %c0_54 = arith.constant 0 : index
    %c0_55 = arith.constant 0 : index
    %57 = vector.load %arg6[%c0_53, %c0_54, %c0_55] : memref<1x16x128xf32, #tpu.memory_space<vmem>>, vector<1x16x128xf32>
    %58 = vector.shape_cast %57 : vector<1x16x128xf32> to vector<16x128xf32>
    %59 = vector.shape_cast %56 : vector<16x128xf32> to vector<1x16x128xf32>
    tpu.vector_store %arg6[%c0_53, %c0_54, %c0_55], %59 {strides = array<i32>} : memref<1x16x128xf32, #tpu.memory_space<vmem>>, vector<1x16x128xf32>,
    return
  }
  func.func @transform_0(%arg0: i32) -> (i32, i32, i32) {
    %c0_i32 = arith.constant 0 : i32
    %c0_i32_0 = arith.constant 0 : i32
    %c0_i32_1 = arith.constant 0 : i32
    return %arg0, %c0_i32, %c0_i32_0 : i32, i32, i32
  }
  func.func @transform_1(%arg0: i32) -> (i32, i32, i32) {
    %c0_i32 = arith.constant 0 : i32
    %c0_i32_0 = arith.constant 0 : i32
    %c0_i32_1 = arith.constant 0 : i32
    %c0_i32_2 = arith.constant 0 : i32
    return %c0_i32, %c0_i32_0, %c0_i32_1 : i32, i32, i32
  }
  func.func @transform_2(%arg0: i32) -> (i32, i32) {
    %c0_i32 = arith.constant 0 : i32
    %c0_i32_0 = arith.constant 0 : i32
    %c0_i32_1 = arith.constant 0 : i32
    return %c0_i32, %c0_i32_0 : i32, i32
  }
  func.func @transform_3(%arg0: i32) -> (i32, i32, i32) {
    %c0_i32 = arith.constant 0 : i32
    %c0_i32_0 = arith.constant 0 : i32
    %c0_i32_1 = arith.constant 0 : i32
    %c0_i32_2 = arith.constant 0 : i32
    return %c0_i32, %c0_i32_0, %c0_i32_1 : i32, i32, i32
  }
  func.func @transform_4(%arg0: i32) -> (i32, i32) {
    %c0_i32 = arith.constant 0 : i32
    %c0_i32_0 = arith.constant 0 : i32
    %c0_i32_1 = arith.constant 0 : i32
    return %c0_i32, %c0_i32_0 : i32, i32
  }
  func.func @transform_5(%arg0: i32) -> (i32, i32, i32) {
    %c0_i32 = arith.constant 0 : i32
    %c0_i32_0 = arith.constant 0 : i32
    %c0_i32_1 = arith.constant 0 : i32
    return %arg0, %c0_i32, %c0_i32_0 : i32, i32, i32
  }
}

</mosaic_0001>

<bundles_post_ra>
// kernel: tile.13
= control target key start
LH: loop header
LB: loop body
LE: loop exit
PB: predicated region body
PF: predicated region fallthrough
CT: control target
= control target key end

     0   :  { %s28_s0 = inlined_call_operand.vmem [shape: f32[8], index: 0, kind: input, shape index: {}]   ;;  %s29_s1 = inlined_call_operand.vmem [shape: f32[16,8], index: 1, kind: output, shape index: {}]  }
   0x1   :  { %v4_v0 = vld [vmem:[%s28_s0] ss:$0 sm:$0xff] }
   0x2   :  { %5 = vst [vmem:[%s29_s1] sm:$0xff] %v4_v0  ;;  %8 = vst [vmem:[%s29_s1 + $0x8] sm:$0xff] %v4_v0 }

// kernel: tile.14
= control target key start
LH: loop header
LB: loop body
LE: loop exit
PB: predicated region body
PF: predicated region fallthrough
CT: control target
= control target key end

     0   :  { %s133_s10 = smov 120   ;;  %s134_s11 = smov 104   ;;  %vm3_vm0 = vcmask 64512   ;;  %vm9_vm1 = vcmask 1048512   ;;  %vm15_vm2 = vcmask 982912   ;;  %vm21_vm3 = vcmask 917312   ;;  %s209_s0 = inlined_call_operand.vmem [shape: f32[16,8], index: 0, kind: input, shape index: {}]   ;;  %s210_s1 = inlined_call_operand.vmem [shape: f32[1,128], index: 1, kind: output, shape index: {}]  }
   0x1   :  { %v103_v0 = vld [vmem:[%s209_s0 + $0xf] sm:$0x1]   ;;  %v105_v1 = vld [vmem:[%s209_s0 + $0xd] sm:$0x1]   ;;  %v104_v2 = vld [vmem:[%s209_s0 + $0xe] sm:$0x1]  }
   0x2   :  { %7 = vrot.lane.b32.xlu0 %v103_v0, %s133_s10  ;;  %19 = vrot.lane.b32.xlu1 %v105_v1, %s134_s11  ;;  %v106_v3 = vld [vmem:[%s209_s0 + $0xc] sm:$0x1]   ;;  %s135_s16 = smov 112   ;;  %s136_s17 = smov 96   ;;  %v107_v4 = vld [vmem:[%s209_s0 + $0xb] sm:$0x1]  }
   0x3   :  { %v108_v5 = vld [vmem:[%s209_s0 + $0xa] sm:$0x1]   ;;  %v2_v6 = vld [vmem:[%s209_s0] sm:$0x1]   ;;  %s137_s24 = smov 88   ;;  %s138_s25 = smov 80  }
   0x4   :  { %4 = vst.msk [vmem:[#allocation0] sm:$0x1] %vm3_vm0, %v2_v6   ;;  %v109_v7 = vld [vmem:[%s209_s0 + $0x9] sm:$0x1]   ;;  %v110_v8 = vld [vmem:[%s209_s0 + $0x8] sm:$0x1]  }
   0x5   :  { %s139_s30 = smov 72   ;;  %s140_s2 = smov 64   ;;  %v111_v9 = vld [vmem:[%s209_s0 + $0x7] sm:$0x1]   ;;  %v112_v10 = vld [vmem:[%s209_s0 + $0x6] sm:$0x1]  }
   0x6   :  { %13 = vrot.lane.b32.xlu0 %v104_v2, %s135_s16  ;;  %25 = vrot.lane.b32.xlu1 %v106_v3, %s136_s17  ;;  %s141_s7 = smov 56   ;;  %s142_s8 = smov 48   ;;  %v113_v11 = vld [vmem:[%s209_s0 + $0x5] sm:$0x1]   ;;  %v114_v12 = vld [vmem:[%s209_s0 + $0x4] sm:$0x1]  }
   0x7   :  { %s143_s13 = smov 40   ;;  %s144_s14 = smov 32   ;;  %v115_v13 = vld [vmem:[%s209_s0 + $0x3] sm:$0x1]   ;;  %v116_v14 = vld [vmem:[%s209_s0 + $0x2] sm:$0x1]  }
   0x8   :  { %s145_s19 = smov 24   ;;  %s146_s20 = smov 16   ;;  %v117_v15 = vld [vmem:[%s209_s0 + $0x1] sm:$0x1]   ;;  %vm27_vm4 = vcmask 851712   ;;  %vm33_vm5 = vcmask 786112  }
   0x9   :  { %s147_s0 = smov 8   ;;  %vm39_vm6 = vcmask 720512   ;;  %vm45_vm7 = vcmask 654912   ;;  %vm51_vm8 = vcmask 589312   ;;  %vm57_vm9 = vcmask 523712  }
   0xa   :  { %31 = vrot.lane.b32.xlu0 %v107_v4, %s137_s24  ;;  %37 = vrot.lane.b32.xlu1 %v108_v5, %s138_s25  ;;  %vm63_vm10 = vcmask 458112   ;;  %vm69_vm11 = vcmask 392512   ;;  %vm75_vm12 = vcmask 326912   ;;  %vm81_vm13 = vcmask 261312  }
   0xb   :  { %vm87_vm14 = vcmask 195712   ;;  %vm93_vm15 = vcmask 130112  }
   0xe   :  { %43 = vrot.lane.b32.xlu0 %v109_v7, %s139_s30  ;;  %49 = vrot.lane.b32.xlu1 %v110_v8, %s140_s2 }
  0x12   :  { %55 = vrot.lane.b32.xlu0 %v111_v9, %s141_s7  ;;  %61 = vrot.lane.b32.xlu1 %v112_v10, %s142_s8 }
  0x16   :  { %67 = vrot.lane.b32.xlu0 %v113_v11, %s143_s13  ;;  %73 = vrot.lane.b32.xlu1 %v114_v12, %s144_s14 }
  0x1a   :  { %79 = vrot.lane.b32.xlu0 %v115_v13, %s145_s19  ;;  %85 = vrot.lane.b32.xlu1 %v116_v14, %s146_s20 }
  0x1e   :  { %91 = vrot.lane.b32.xlu0 %v117_v15, %s147_s0 }
  0x74   :  { %v8_v16 = vpop.permute.xlu0 %7   ;;  %v20_v17 = vpop.permute.xlu1 %19  }
  0x75   :  { %10 = vst.msk [vmem:[#allocation0] sm:$0x1] %vm9_vm1, %v8_v16  }
  0x78   :  { %v14_v18 = vpop.permute.xlu0 %13   ;;  %v26_v19 = vpop.permute.xlu1 %25  }
  0x79   :  { %16 = vst.msk [vmem:[#allocation0] sm:$0x1] %vm15_vm2, %v14_v18  }
  0x7a   :  { %22 = vst.msk [vmem:[#allocation0] sm:$0x1] %vm21_vm3, %v20_v17  }
  0x7b   :  { %28 = vst.msk [vmem:[#allocation0] sm:$0x1] %vm27_vm4, %v26_v19  }
  0x7c   :  { %v32_v20 = vpop.permute.xlu0 %31   ;;  %v38_v21 = vpop.permute.xlu1 %37  }
  0x7d   :  { %34 = vst.msk [vmem:[#allocation0] sm:$0x1] %vm33_vm5, %v32_v20  }
  0x7e   :  { %40 = vst.msk [vmem:[#allocation0] sm:$0x1] %vm39_vm6, %v38_v21  }
  0x80   :  { %v44_v22 = vpop.permute.xlu0 %43   ;;  %v50_v23 = vpop.permute.xlu1 %49  }
  0x81   :  { %46 = vst.msk [vmem:[#allocation0] sm:$0x1] %vm45_vm7, %v44_v22  }
  0x82   :  { %52 = vst.msk [vmem:[#allocation0] sm:$0x1] %vm51_vm8, %v50_v23  }
  0x84   :  { %v56_v24 = vpop.permute.xlu0 %55   ;;  %v62_v25 = vpop.permute.xlu1 %61  }
  0x85   :  { %58 = vst.msk [vmem:[#allocation0] sm:$0x1] %vm57_vm9, %v56_v24  }
  0x86   :  { %64 = vst.msk [vmem:[#allocation0] sm:$0x1] %vm63_vm10, %v62_v25  }
  0x88   :  { %v68_v26 = vpop.permute.xlu0 %67   ;;  %v74_v27 = vpop.permute.xlu1 %73  }
  0x89   :  { %70 = vst.msk [vmem:[#allocation0] sm:$0x1] %vm69_vm11, %v68_v26  }
  0x8a   :  { %76 = vst.msk [vmem:[#allocation0] sm:$0x1] %vm75_vm12, %v74_v27  }
  0x8c   :  { %v80_v28 = vpop.permute.xlu0 %79   ;;  %v86_v29 = vpop.permute.xlu1 %85  }
  0x8d   :  { %82 = vst.msk [vmem:[#allocation0] sm:$0x1] %vm81_vm13, %v80_v28  }
  0x8e   :  { %88 = vst.msk [vmem:[#allocation0] sm:$0x1] %vm87_vm14, %v86_v29  }
  0x90   :  { %v92_v30 = vpop.permute.xlu0 %91  }
  0x91   :  { %94 = vst.msk [vmem:[#allocation0] sm:$0x1] %vm93_vm15, %v92_v30  }
  0x98   :  { %v99_v31 = vld [vmem:[#allocation0] sm:$0x1] }
  0x99   :  { %102 = vst [vmem:[%s210_s1] sm:$0x1] %v99_v31 }

// kernel: basic_block_slab.1
= control target key start
LH: loop header
LB: loop body
LE: loop exit
PB: predicated region body
PF: predicated region fallthrough
CT: control target
= control target key end

     0   :  { %10 = vsyncpa [#allocation4], 0  ;;  %s1992_s0 = inlined_call_operand.vmem [shape: f32[2,16,128], index: 0, kind: input, shape index: {}]   ;;  %s1993_s1 = inlined_call_operand.vmem [shape: bf16[3,128,128], index: 1, kind: input, shape index: {}]   ;;  %s1994_s2 = inlined_call_operand.vmem [shape: f32[1,128], index: 2, kind: input, shape index: {}]   ;;  %s1995_s3 = inlined_call_operand.vmem [shape: bf16[3,128,128], index: 3, kind: input, shape index: {}]   ;;  %s1996_s4 = inlined_call_operand.vmem [shape: f32[1,128], index: 4, kind: input, shape index: {}]   ;;  %s1997_s5 = inlined_call_operand.hbm [shape: f32[2,16,128], index: 5, kind: output, shape index: {}]  }
   0x1   :  { %12 = vsyncpa [#allocation4 + $0x1], 0  ;;  %s1688_s18 = smov 0   ;;  %s1690_s19 = smov 0  }
   0x2   :  { %s1692_s20 = smov 0   ;;  %s1694_s21 = smov 0  }
   0x3 LB: > { %s1709_s22 = sadd.s32 4294967295, %s1653_s21   ;;  %s1171_s23 = sadd.s32 4294967294, %s1653_s21   ;;  %s1653_s21 = sphi %s1694_s21, %s2009_s21   ;;  %s1649_s20 = sphi %s1692_s20, %s2008_s20   ;;  %s1645_s19 = sphi %s1690_s19, %s2007_s19   ;;  %s1641_s18 = sphi %s1688_s18, %s2006_s18  }
   0x4   : > { %s1713_s24 = sadd.s32 1, %s1653_s21   ;;  %s135_s25 = sadd.s32 1, %s1649_s20 }
   0x5   : > { %s132_s26 = ssub.s32 %s1653_s21, %s1713_s24  ;;  %p145_p0 = scmp.ne.s32.totalorder %s1649_s20, %s1645_s19 }
   0x6   : > { %p133_p1 = scmp.eq.s32.totalorder %s132_s26, 0  ;;  %p146_p2 = scmp.eq.s32.totalorder %s1709_s22, 1 }
   0x7   : > { %p151_p3 = scmp.ne.s32.totalorder %s1645_s19, %s1641_s18  ;;  %p152_p4 = scmp.eq.s32.totalorder %s1171_s23, 1 }
   0x8   : > { %s1724_s27 = scalar_select %p133_p1, %s1649_s20, %s135_s25  }
   0x9   : > { %p1726_p5 = por %p146_p2, %p145_p0  ;;  %p1730_p6 = por %p152_p4, %p151_p3 }
   0xa   : > { %p1174_p7 = scmp.ge.s32.totalorder %s1653_s21, 1  ;;  %p190_p8 = scmp.lt.s32.totalorder %s1653_s21, 3 }
   0xc   : > { %p191_p9 = pnand %p1174_p7, %p190_p8 }
   0xd   : > { %p218_p10 = scmp.lt.s32.totalorder (!%p191_p9), %s1709_s22, 1  ;;  %s215_s12 = sand.u32 (!%p191_p9), 1, %s1645_s19  }
   0xe   : > { %194 = sbr.rel (%p191_p9) target bundleno = 569 (0x239), region = 40  ;;  %s1314_s23 = sshll.u32 (!%p191_p9), %s1709_s22, 8 }
   0xf   : > { %s1948_s30 = scalar_lea.hbm (!%p191_p9), %s1997_s5, %s1314_s23 }
  0x13   : > { %v1537_v0 = vld [vmem:[%s1993_s1 + $0x78] sm:$0xff]   ;;  %v1539_v2 = vld [vmem:[%s1993_s1 + $0x70] sm:$0xff]   ;;  %v1541_v4 = vld [vmem:[%s1993_s1 + $0x68] sm:$0xff]   ;;  %s219_s17 = scalar_select %p218_p10, %s1709_s22, 1  ;;  %vm224_vm0 = vcmask 1040384   ;;  %vm266_vm6 = vcmask 1043456  }
  0x14   : > { %v1538_v1 = vld [vmem:[%s1993_s1 + $0x38] sm:$0xff]   ;;  %1375 = vmatprep.subr.bf16.mxu0 %v1537_v0  ;;  %v1540_v3 = vld [vmem:[%s1993_s1 + $0x30] sm:$0xff]   ;;  %v1542_v5 = vld [vmem:[%s1993_s1 + $0x28] sm:$0xff]   ;;  %vm225_vm1 = vsmask.f32 256  ;;  %vm554_vm10 = vcmask 1046528  }
  0x15   : > { %1395 = vmatprep.subr.bf16.mxu1 %v1538_v1  ;;  %1376 = vmatpush3.bf16.msra.mxu0 %v1537_v0  ;;  %v1543_v6 = vld [vmem:[%s1993_s1 + $0x60] sm:$0xff]   ;;  %s1309_s6 = sshll.u32 %s219_s17, 4  ;;  %v1545_v8 = vld [vmem:[%s1993_s1 + $0x58] sm:$0xff]   ;;  %v1547_v10 = vld [vmem:[%s1993_s1 + $0x50] sm:$0xff]   ;;  %vm230_vm2 = vsmask.f32 7938 }
  0x16   : > { %1396 = vmatpush3.bf16.msra.mxu1 %v1538_v1  ;;  %1377 = vmatprep.subr.bf16.mxu0 %v1539_v2  ;;  %v1544_v7 = vld [vmem:[%s1993_s1 + $0x20] sm:$0xff]   ;;  %v1546_v9 = vld [vmem:[%s1993_s1 + $0x18] sm:$0xff]   ;;  %s222_s15 = scalar_lea.vmem %s1992_s0, %s1309_s6  ;;  %v1548_v11 = vld [vmem:[%s1993_s1 + $0x10] sm:$0xff]   ;;  %vm244_vm5 = vsmask.f32 4368  ;;  %s1952_s6 = scalar_lea.sflag [#allocation4], %s215_s12 }
  0x17   : > { %1397 = vmatprep.subr.bf16.mxu1 %v1540_v3  ;;  %v227_v12 = vld [vmem:[#allocation2] sm:$0x1]  ;;  %vm1778_vm3 = vmand %vm224_vm0, %vm225_vm1  ;;  %v232_v14 = vld [vmem:[#allocation2 + $0x8] sm:$0x1]  ;;  %vm320_vm9 = vsmask.f32 7424 }
  0x18   : > { %v1782_v15 = vld [vmem:[%s222_s15] sm:$0xff]  ;;  %v228_v16 = vsel %vm1778_vm3, 0, %v227_v12  ;;  %vm231_vm4 = vmand %vm224_vm0, %vm230_vm2  ;;  %v1787_v17 = vld [vmem:[%s222_s15 + $0x8] sm:$0xff]  ;;  %s1175_s15 = sshll.u32 %s215_s12, 4  ;;  %s1655_s22 = smov [#allocation3]  }
  0x19   : > { %1378 = vmatpush3.bf16.msra.mxu0 %v1539_v2  ;;  %v1310_v18 = vpack.c.bf16 %v1782_v15, %v1782_v15  ;;  %v1549_v19 = vld [vmem:[%s1993_s1 + $0x48] sm:$0xff]   ;;  %229 = vst [vmem:[#allocation2] sm:$0x1] %v228_v16  ;;  %v233_v20 = vsel %vm231_vm4, 0, %v232_v14  ;;  %v1311_v21 = vpack.c.bf16 %v1787_v17, %v1787_v17  ;;  %v1551_v27 = vld [vmem:[%s1993_s1 + $0x40] sm:$0xff]   ;;  %vm1803_vm7 = vmor %vm225_vm1, %vm244_vm5  ;;  %s217_s16 = scalar_lea.vmem [#allocation3], %s1175_s15 }
  0x1a   : > { %1398 = vmatpush3.bf16.msra.mxu1 %v1540_v3  ;;  %1379 = vmatprep.subr.bf16.mxu0 %v1541_v4  ;;  %234 = vst [vmem:[#allocation2 + $0x8] sm:$0x1] %v233_v20  ;;  %v1550_v24 = vld [vmem:[%s1993_s1 + $0x8] sm:$0xff]   ;;  %vm1808_vm8 = vmand %vm266_vm6, %vm230_vm2  ;;  %v1552_v34 = vld [vmem:[%s1993_s1] sm:$0xff]   ;;  %s1109_s17 = sshll.u32 %s217_s16, 4  ;;  %s1597_s8 = sshll.u32 %s1655_s22, 4  ;;  %s1950_s17 = int_to_ptr.vmem [resolvable:$true] %s1109_s17  ;;  %s1598_s8 = int_to_ptr.vmem [resolvable:$false] %s1597_s8 }
  0x1b   : > { %1399 = vmatprep.subr.bf16.mxu1 %v1542_v5  ;;  %v247_v22 = vshrl.u32 %v1310_v18, 16  ;;  %v250_v23 = vshll.u32 %v1310_v18, 16  ;;  %v255_v25 = vshrl.u32 %v1311_v21, 16  ;;  %v258_v26 = vshll.u32 %v1311_v21, 16  ;;  %v1556_v41 = vld [vmem:[%s1993_s1 + $0xb8] sm:$0xff]   ;;  %v1557_v60 = vld [vmem:[%s1993_s1 + $0xb0] sm:$0xff]   ;;  %p1600_p0 = scmp.lt.s32.totalorder %s1950_s17, %s1598_s8 }
  0x1c   : > { %v1558_v63 = vld [vmem:[%s1993_s1 + $0xa8] sm:$0xff]   ;;  %v1559_v0 = vld [vmem:[%s1993_s1 + $0xa0] sm:$0xff]   ;;  %v1560_v1 = vld [vmem:[%s1993_s1 + $0x98] sm:$0xff]   ;;  %s1593_s7 = scalar_lea.vmem %s1950_s17, 256  ;;  %s1599_s9 = scalar_lea.vmem %s1598_s8, 512 }
  0x1d   : > { %1380 = vmatpush3.bf16.msra.mxu0 %v1541_v4  ;;  %v249_v28 = vrot.slane %v247_v22, 7  ;;  %v257_v30 = vrot.slane %v255_v25, 7  ;;  %v1561_v2 = vld [vmem:[%s1993_s1 + $0x90] sm:$0xff]   ;;  %v1562_v3 = vld [vmem:[%s1993_s1 + $0x88] sm:$0xff]   ;;  %v1563_v4 = vld [vmem:[%s1993_s1 + $0x80] sm:$0xff]   ;;  %p1594_p11 = scmp.ne.s32.totalorder %s1950_s17, %s1593_s7  ;;  %p1601_p1 = scmp.lt.s32.totalorder %s1599_s9, %s1593_s7 }
  0x1e   : > { %1400 = vmatpush3.bf16.msra.mxu1 %v1542_v5  ;;  %1381 = vmatprep.subr.bf16.mxu0 %v1543_v6  ;;  %v1565_v5 = vld [vmem:[%s1995_s3 + $0x38] sm:$0xff]   ;;  %v1573_v14 = vld [vmem:[%s1995_s3 + $0x60] sm:$0xff]   ;;  %v1574_v16 = vld [vmem:[%s1995_s3 + $0x10] sm:$0xff]  }
  0x1f   : > { %1401 = vmatprep.subr.bf16.mxu1 %v1544_v7  ;;  %v252_v31 = vor.u32 %v250_v23, %v249_v28  ;;  %v253_v32 = vrot.slane %v249_v28, 4  ;;  %v260_v35 = vor.u32 %v258_v26, %v257_v30  ;;  %v262_v36 = vrot.slane %v257_v30, 4  ;;  %v1572_v12 = vld [vmem:[%s1995_s3 + $0x18] sm:$0xff]   ;;  %v1577_v20 = vld [vmem:[%s1995_s3 + $0x50] sm:$0xff]   ;;  %v1578_v21 = vld [vmem:[%s1995_s3] sm:$0xff]   ;;  %p1595_p12 = pnand %p1594_p11, %p1726_p5  ;;  %p1602_p2 = por %p1601_p1, %p1600_p0 }
  0x20   : > { %v268_v37 = vld [vmem:[#allocation2] sm:$0xf]  ;;  %v1575_v18 = vld [vmem:[%s1995_s3 + $0x58] sm:$0xff]   ;;  %v1579_v22 = vld [vmem:[%s1995_s3 + $0x48] sm:$0xff]  }
  0x21   : > { %1382 = vmatpush3.bf16.msra.mxu0 %v1543_v6  ;;  %v261_v38 = vsel %vm1803_vm7, %v253_v32, %v260_v35  ;;  %v269_v39 = vsel %vm1808_vm8, %v252_v31, %v268_v37  ;;  %v272_v40 = vld [vmem:[#allocation2 + $0x8] sm:$0x1]  ;;  %v1566_v6 = vld [vmem:[%s1995_s3 + $0x30] sm:$0xff]   ;;  %v1583_v23 = vld [vmem:[%s1995_s3 + $0x40] sm:$0xff]   ;;  %p1596_p13 = pneg %p1595_p12 }
  0x22   : > { %1402 = vmatpush3.bf16.msra.mxu1 %v1544_v7  ;;  %1383 = vmatprep.subr.bf16.mxu0 %v1545_v8  ;;  %270 = vst [vmem:[#allocation2] sm:$0xf] %v269_v39  ;;  %271 = vst [vmem:[#allocation2 + $0x4] sm:$0xf] %v261_v38  ;;  %v273_v42 = vsel %vm1778_vm3, %v262_v36, %v272_v40  ;;  %v1567_v7 = vld [vmem:[%s1995_s3 + $0x78] sm:$0xff]  }
  0x23   : > { %1403 = vmatprep.subr.bf16.mxu1 %v1546_v9  ;;  %274 = vst [vmem:[#allocation2 + $0x8] sm:$0x1] %v273_v42  ;;  %v1240_v38 = vld [vmem:[%s1994_s2] ss:$0 sm:$0xff]  ;;  %p1603_p3 = pnand %p1602_p2, %p1596_p13 }
  0x25   : > { %1384 = vmatpush3.bf16.msra.mxu0 %v1545_v8  ;;  %v1568_v8 = vld [vmem:[%s1995_s3 + $0x28] sm:$0xff]  }
  0x26   : > { %1404 = vmatpush3.bf16.msra.mxu1 %v1546_v9  ;;  %1385 = vmatprep.subr.bf16.mxu0 %v1547_v10  ;;  %v1569_v9 = vld [vmem:[%s1995_s3 + $0x70] sm:$0xff]  }
  0x27   : > { %1405 = vmatprep.subr.bf16.mxu1 %v1548_v11 }
  0x29   : > { %1386 = vmatpush3.bf16.msra.mxu0 %v1547_v10  ;;  %v1824_v43 = vld [vmem:[#allocation2] sm:$0xf]  ;;  %v276_v44 = vld [vmem:[#allocation2 + $0x4] sm:$0xf] }
  0x2a   : > { %1406 = vmatpush3.bf16.msra.mxu1 %v1548_v11  ;;  %1387 = vmatprep.subr.bf16.mxu0 %v1549_v19  ;;  %v533_v45 = vld [vmem:[#allocation2] sm:$0xe]  ;;  %v1196_v46 = vcombine.low %v1824_v43, %v276_v44  ;;  %v1554_v47 = vld [vmem:[#allocation2 + $0x8] ss:$0 sps:$4 sm:$0x33]  }
  0x2b   : > { %1407 = vmatprep.subr.bf16.mxu1 %v1550_v24  ;;  %v1231_v48 = vcombine.low %v533_v45, %v276_v44  ;;  %v1555_v49 = vld [vmem:[#allocation2 + $0x8] ss:$0 sps:$4 sm:$0x11]   ;;  %v329_v52 = vshll.u32 %v1554_v47, 16  ;;  %v333_v53 = vshrl.u32 %v1554_v47, 16  ;;  %v556_v55 = vrot.slane %v1554_v47, 1 }
  0x2c   : > { %v322_v50 = vshrl.u32 %v1196_v46, 16  ;;  %v324_v51 = vshll.u32 %v1196_v46, 16  ;;  %1411 = vmatprep.mubr.bf16.mxu1 %v1196_v46  ;;  %v1570_v10 = vld [vmem:[%s1995_s3 + $0x20] sm:$0xff]   ;;  %v1571_v11 = vld [vmem:[%s1995_s3 + $0x68] sm:$0xff]  }
  0x2d   : > { %1388 = vmatpush3.bf16.msra.mxu0 %v1549_v19  ;;  %v555_v54 = vrot.slane %v1231_v48, 1  ;;  %v331_v57 = vrot.slane %v329_v52, 1  ;;  %v1576_v19 = vld [vmem:[%s1995_s3 + $0x8] sm:$0xff]  }
  0x2e   : > { %1408 = vmatpush3.bf16.msra.mxu1 %v1550_v24  ;;  %1389 = vmatprep.subr.bf16.mxu0 %v1551_v27  ;;  %v326_v56 = vrot.slane %v324_v51, 1  ;;  %v1901_v24 = vld [vmem:[%s1995_s3 + $0xb8] sm:$0xff]  }
  0x2f   : > { %1409 = vmatprep.subr.bf16.mxu1 %v1552_v34  ;;  %v335_v59 = vor.u32 %v333_v53, %v331_v57  ;;  %v557_v62 = vsel %vm554_vm10, %v555_v54, %v556_v55 }
  0x30   : > { %v327_v58 = vor.u32 %v326_v56, %v322_v50 }
  0x31   : > { %1390 = vmatpush3.bf16.msra.mxu0 %v1551_v27 }
  0x32   : > { %1410 = vmatpush3.bf16.msra.mxu1 %v1552_v34  ;;  %1415 = vmatprep.subr.bf16.mxu0 %v1556_v41  ;;  %v332_v61 = vsel %vm320_vm9, %v327_v58, %v331_v57 }
  0x33   : > { %1391 = vmatprep.mubr.bf16.mxu0 %v332_v61  ;;  %1435 = vmatprep.subr.bf16.mxu1 %v1567_v7 }
  0x34   : > { %1392 = vmatmul.mubr.bf16.vlgmr.msra.gmra.mxu0 %v335_v59  ;;  %v697_v59 = vld [vmem:[#allocation2 + $0x8] sm:$0x1] }
  0x35   : > { %1412 = vmatmul.mubr.bf16.vlgmr.msra.gmra.mxu1 %v1555_v49  ;;  %1416 = vmatpush3.bf16.msra.mxu0 %v1556_v41 }
  0x36   : > { %1431 = vmatprep.mubr.bf16.mxu0 %v557_v62  ;;  %1417 = vmatprep.subr.bf16.mxu0 %v1557_v60 }
  0x37   : > { %1436 = vmatpush3.bf16.msra.mxu1 %v1567_v7 }
  0x38   : > { %1437 = vmatprep.subr.bf16.mxu1 %v1569_v9 }
  0x39   : > { %1418 = vmatpush3.bf16.msra.mxu0 %v1557_v60 }
  0x3a   : > { %1419 = vmatprep.subr.bf16.mxu0 %v1558_v63 }
  0x3b   : > { %1438 = vmatpush3.bf16.msra.mxu1 %v1569_v9 }
  0x3c   : > { %1439 = vmatprep.subr.bf16.mxu1 %v1571_v11 }
  0x3d   : > { %1420 = vmatpush3.bf16.msra.mxu0 %v1558_v63 }
  0x3e   : > { %1421 = vmatprep.subr.bf16.mxu0 %v1559_v0 }
  0x3f   : > { %1440 = vmatpush3.bf16.msra.mxu1 %v1571_v11 }
  0x40   : > { %1441 = vmatprep.subr.bf16.mxu1 %v1573_v14 }
  0x41   : > { %1422 = vmatpush3.bf16.msra.mxu0 %v1559_v0 }
  0x42   : > { %1423 = vmatprep.subr.bf16.mxu0 %v1560_v1 }
  0x43   : > { %1442 = vmatpush3.bf16.msra.mxu1 %v1573_v14 }
  0x44   : > { %1443 = vmatprep.subr.bf16.mxu1 %v1575_v18 }
  0x45   : > { %1424 = vmatpush3.bf16.msra.mxu0 %v1560_v1 }
  0x46   : > { %1425 = vmatprep.subr.bf16.mxu0 %v1561_v2 }
  0x47   : > { %1444 = vmatpush3.bf16.msra.mxu1 %v1575_v18  ;;  %v1586_v18 = vld [vmem:[%s1995_s3 + $0xb0] sm:$0xff]  }
  0x48   : > { %1445 = vmatprep.subr.bf16.mxu1 %v1577_v20 }
  0x49   : > { %1426 = vmatpush3.bf16.msra.mxu0 %v1561_v2 }
  0x4a   : > { %1427 = vmatprep.subr.bf16.mxu0 %v1562_v3 }
  0x4b   : > { %1446 = vmatpush3.bf16.msra.mxu1 %v1577_v20  ;;  %v1587_v20 = vld [vmem:[%s1995_s3 + $0xa8] sm:$0xff]  }
  0x4c   : > { %1447 = vmatprep.subr.bf16.mxu1 %v1579_v22 }
  0x4d   : > { %1428 = vmatpush3.bf16.msra.mxu0 %v1562_v3 }
  0x4e   : > { %1429 = vmatprep.subr.bf16.mxu0 %v1563_v4 }
  0x4f   : > { %1448 = vmatpush3.bf16.msra.mxu1 %v1579_v22  ;;  %v1589_v22 = vld [vmem:[%s1995_s3 + $0x98] sm:$0xff]  }
  0x50   : > { %1449 = vmatprep.subr.bf16.mxu1 %v1583_v23 }
  0x51   : > { %1430 = vmatpush3.bf16.msra.mxu0 %v1563_v4 }
  0x52   : > { %1455 = vmatprep.subr.bf16.mxu0 %v1565_v5 }
  0x53   : > { %1450 = vmatpush3.bf16.msra.mxu1 %v1583_v23  ;;  %v1590_v23 = vld [vmem:[%s1995_s3 + $0x90] sm:$0xff]  }
  0x54   : > { %1432 = vmatmul.mubr.bf16.vlgmr.msra.gmra.mxu0 %v556_v55  ;;  %1475 = vmatprep.subr.bf16.mxu1 %v1901_v24 }
  0x55   : > { %1456 = vmatpush3.bf16.msra.mxu0 %v1565_v5 }
  0x56   : > { %1457 = vmatprep.subr.bf16.mxu0 %v1566_v6 }
  0x59   : > { %1458 = vmatpush3.bf16.msra.mxu0 %v1566_v6 }
  0x5a   : > { %1459 = vmatprep.subr.bf16.mxu0 %v1568_v8 }
  0x5d   : > { %1460 = vmatpush3.bf16.msra.mxu0 %v1568_v8 }
  0x5e   : > { %1461 = vmatprep.subr.bf16.mxu0 %v1570_v10 }
  0x61   : > { %1462 = vmatpush3.bf16.msra.mxu0 %v1570_v10 }
  0x62   : > { %1463 = vmatprep.subr.bf16.mxu0 %v1572_v12 }
  0x65   : > { %1464 = vmatpush3.bf16.msra.mxu0 %v1572_v12 }
  0x66   : > { %1465 = vmatprep.subr.bf16.mxu0 %v1574_v16 }
  0x69   : > { %1466 = vmatpush3.bf16.msra.mxu0 %v1574_v16 }
  0x6a   : > { %1467 = vmatprep.subr.bf16.mxu0 %v1576_v19 }
  0x6d   : > { %1468 = vmatpush3.bf16.msra.mxu0 %v1576_v19 }
  0x6e   : > { %1469 = vmatprep.subr.bf16.mxu0 %v1578_v21 }
  0x71   : > { %1470 = vmatpush3.bf16.msra.mxu0 %v1578_v21  ;;  %v1588_v21 = vld [vmem:[%s1995_s3 + $0xa0] sm:$0xff]  }
  0xf4   : > { %v1393_v28 = vpop.f32.mrf.mxu0 }
  0xf5   : > { %v1413_v25 = vpop.f32.mrf.mxu1 }
  0xf6   : > { %v420_v30 = vpop.f32.mrf.mxu0  ;;  %v1592_v25 = vld [vmem:[%s1995_s3 + $0x80] sm:$0xff]  }
  0xf7   : > { %v520_v26 = vpop.f32.mrf.mxu1 }
  0xf8   : > { %v1394_v31 = vpop.f32.mrf.mxu0  ;;  %v521_v35 = vadd.f32 %v520_v26, %v420_v30 }
  0xf9   : > { %v1414_v27 = vpop.f32.mrf.mxu1 }
  0xfa   : > { %v423_v32 = vpop.f32.mrf.mxu0 }
  0xfb   : > { %v523_v36 = vpop.f32.mrf.mxu1 }
  0xfc   : > { %v524_v41 = vadd.f32 %v523_v36, %v423_v32 }
 0x114   : > { %v1433_v34 = vpop.f32.mrf.mxu0 }
 0x116   : > { %v642_v37 = vpop.f32.mrf.mxu0 }
 0x117   : > { %v655_v39 = vadd.f32 %v642_v37, %v521_v35 }
 0x118   : > { %v1434_v40 = vpop.f32.mrf.mxu0 }
 0x119   : > { %v664_v42 = vadd.f32 %v1240_v38, %v655_v39 }
 0x11a   : > { %v645_v44 = vpop.f32.mrf.mxu0 }
 0x11b   : > { %v666_v45 = vmax.f32 %v664_v42, 0.0  ;;  %v656_v46 = vadd.f32 %v645_v44, %v524_v41 }
 0x11d   : > { %v1312_v47 = vpack.c.bf16 %v666_v45, %v666_v45  ;;  %v665_v48 = vadd.f32 %v1240_v38, %v656_v46  ;;  %v1303_v38 = vld [vmem:[%s1996_s4] ss:$0 sm:$0xff] }
 0x11f   : > { %v675_v49 = vshrl.u32 %v1312_v47, 16  ;;  %v667_v50 = vmax.f32 %v665_v48, 0.0  ;;  %v678_v52 = vshll.u32 %v1312_v47, 16 }
 0x121   : > { %v677_v51 = vrot.slane %v675_v49, 7  ;;  %v1313_v53 = vpack.c.bf16 %v667_v50, %v667_v50 }
 0x123   : > { %v680_v54 = vor.u32 %v678_v52, %v677_v51  ;;  %v683_v55 = vshrl.u32 %v1313_v53, 16  ;;  %v686_v58 = vshll.u32 %v1313_v53, 16  ;;  %v681_v60 = vrot.slane %v677_v51, 4 }
 0x125   : > { %v694_v56 = vsel %vm1808_vm8, %v680_v54, %v1824_v43  ;;  %v685_v57 = vrot.slane %v683_v55, 7 }
 0x126   : > { %695 = vst [vmem:[#allocation2] sm:$0xf] %v694_v56 }
 0x127   : > { %v688_v61 = vor.u32 %v686_v58, %v685_v57  ;;  %v690_v62 = vrot.slane %v685_v57, 4 }
 0x129   : > { %v689_v63 = vsel %vm1803_vm7, %v681_v60, %v688_v61  ;;  %v698_v0 = vsel %vm1778_vm3, %v690_v62, %v697_v59 }
 0x12a   : > { %696 = vst [vmem:[#allocation2 + $0x4] sm:$0xf] %v689_v63  ;;  %699 = vst [vmem:[#allocation2 + $0x8] sm:$0x1] %v698_v0 }
 0x12d   : > { %v700_v1 = vld [vmem:[#allocation2] sm:$0xf] }
 0x12e   : > { %v957_v43 = vld [vmem:[#allocation2] sm:$0xe] }
 0x131   : > { %v701_v2 = vld [vmem:[#allocation2 + $0x4] sm:$0xf]  ;;  %v1584_v33 = vld [vmem:[#allocation2 + $0x8] ss:$0 sps:$4 sm:$0x33]  }
 0x132   : > { %v1259_v3 = vcombine.low %v700_v1, %v701_v2  ;;  %v1582_v4 = vld [vmem:[#allocation2 + $0x8] ss:$0 sps:$4 sm:$0x11]   ;;  %v1294_v6 = vcombine.low %v957_v43, %v701_v2  ;;  %v753_v7 = vshll.u32 %v1584_v33, 16  ;;  %v757_v11 = vshrl.u32 %v1584_v33, 16 }
 0x133   : > { %v979_v12 = vrot.slane %v1584_v33, 1 }
 0x134   : > { %v748_v5 = vshll.u32 %v1259_v3, 16  ;;  %1471 = vmatprep.mubr.bf16.mxu0 %v1259_v3  ;;  %v746_v8 = vshrl.u32 %v1259_v3, 16  ;;  %v755_v29 = vrot.slane %v753_v7, 1  ;;  %v978_v13 = vrot.slane %v1294_v6, 1 }
 0x135   : > { %1472 = vmatmul.mubr.bf16.vlgmr.msra.gmra.mxu0 %v1582_v4 }
 0x136   : > { %v750_v9 = vrot.slane %v748_v5, 1  ;;  %v759_v16 = vor.u32 %v757_v11, %v755_v29  ;;  %v980_v19 = vsel %vm554_vm10, %v978_v13, %v979_v12 }
 0x138   : > { %v751_v10 = vor.u32 %v750_v9, %v746_v8 }
 0x13a   : > { %v756_v14 = vsel %vm320_vm9, %v751_v10, %v755_v29 }
 0x13b   : > { %1451 = vmatprep.mubr.bf16.mxu1 %v756_v14 }
 0x13c   : > { %1452 = vmatmul.mubr.bf16.vlgmr.msra.gmra.mxu1 %v759_v16 }
 0x13d   : > { %1476 = vmatpush3.bf16.msra.mxu1 %v1901_v24  ;;  %1491 = vmatprep.mubr.bf16.mxu1 %v980_v19  ;;  %v1591_v24 = vld [vmem:[%s1995_s3 + $0x88] sm:$0xff]  }
 0x13e   : > { %1477 = vmatprep.subr.bf16.mxu1 %v1586_v18 }
 0x141   : > { %1478 = vmatpush3.bf16.msra.mxu1 %v1586_v18 }
 0x142   : > { %1479 = vmatprep.subr.bf16.mxu1 %v1587_v20 }
 0x145   : > { %1480 = vmatpush3.bf16.msra.mxu1 %v1587_v20 }
 0x146   : > { %1481 = vmatprep.subr.bf16.mxu1 %v1588_v21 }
 0x149   : > { %1482 = vmatpush3.bf16.msra.mxu1 %v1588_v21 }
 0x14a   : > { %1483 = vmatprep.subr.bf16.mxu1 %v1589_v22 }
 0x14d   : > { %1484 = vmatpush3.bf16.msra.mxu1 %v1589_v22 }
 0x14e   : > { %1485 = vmatprep.subr.bf16.mxu1 %v1590_v23 }
 0x151   : > { %1486 = vmatpush3.bf16.msra.mxu1 %v1590_v23 }
 0x152   : > { %1487 = vmatprep.subr.bf16.mxu1 %v1591_v24 }
 0x155   : > { %1488 = vmatpush3.bf16.msra.mxu1 %v1591_v24 }
 0x156   : > { %1489 = vmatprep.subr.bf16.mxu1 %v1592_v25 }
 0x159   : > { %1490 = vmatpush3.bf16.msra.mxu1 %v1592_v25 }
 0x15c   : > { %1492 = vmatmul.mubr.bf16.vlgmr.msra.gmra.mxu1 %v979_v12 }
 0x1f5   : > { %v1473_v26 = vpop.f32.mrf.mxu0 }
 0x1f7   : > { %v944_v27 = vpop.f32.mrf.mxu0 }
 0x1f9   : > { %v1474_v28 = vpop.f32.mrf.mxu0 }
 0x1fb   : > { %v947_v40 = vpop.f32.mrf.mxu0 }
 0x1fc   : > { %v1453_v30 = vpop.f32.mrf.mxu1 }
 0x1fe   : > { %v844_v31 = vpop.f32.mrf.mxu1 }
 0x1ff   : > { %v945_v36 = vadd.f32 %v944_v27, %v844_v31 }
 0x200   : > { %v1454_v32 = vpop.f32.mrf.mxu1 }
 0x202   : > { %v847_v34 = vpop.f32.mrf.mxu1 }
 0x203   : > { %v948_v42 = vadd.f32 %v947_v40, %v847_v34 }
 0x21c   : > { %v1493_v35 = vpop.f32.mrf.mxu1 }
 0x21e   : > { %v1065_v37 = vpop.f32.mrf.mxu1 }
 0x21f   : > { %v1078_v39 = vadd.f32 %v1065_v37, %v945_v36 }
 0x220   : > { %v1494_v41 = vpop.f32.mrf.mxu1 }
 0x221   : > { %v1087_v44 = vadd.f32 %v1303_v38, %v1078_v39 }
 0x222   : > { %v1068_v45 = vpop.f32.mrf.mxu1 }
 0x223   : > { %v1089_v46 = vadd.f32 %v1087_v44, %v1782_v15  ;;  %v1079_v47 = vadd.f32 %v1068_v45, %v948_v42 }
 0x225   : > { %v1091_v48 = vmax.f32 %v1089_v46, 0.0  ;;  %v1088_v49 = vadd.f32 %v1303_v38, %v1079_v47 }
 0x227   : > { %1093 = vst [vmem:[%s217_s16] sm:$0xff] %v1091_v48  ;;  %v1090_v50 = vadd.f32 %v1088_v49, %v1787_v17 }
 0x229   : > { %v1092_v15 = vmax.f32 %v1090_v50, 0.0 }
 0x22b   : > { %1094 = vst [vmem:[%s217_s16 + $0x8] sm:$0xff] %v1092_v15 }
 0x22c   : > { %1606 = shalt.err (!%p1603_p3)
}
 0x22d   : > { %s1607_s10 = scalar_lea.hbm %s1948_s30, 256  ;;  %s1611_s13 = scalar_lea.hbm %s1997_s5, 512 }
 0x22e   : > { %p1608_p4 = scmp.ne.s32.totalorder %s1948_s30, %s1607_s10  ;;  %p1612_p9 = scmp.lt.s32.totalorder %s1948_s30, %s1997_s5 }
 0x22f   : > { %p1613_p10 = scmp.lt.s32.totalorder %s1611_s13, %s1607_s10 }
 0x230   : > { %p1609_p7 = pnand %p1608_p4, %p1726_p5 }
 0x231   : > { %p1614_p11 = por %p1613_p10, %p1612_p9 }
 0x232   : > { %p1610_p8 = pneg %p1609_p7 }
 0x234   : > { %p1615_p12 = pnand %p1614_p11, %p1610_p8 }
 0x236   : > { %1618 = shalt.err (!%p1615_p12)
}
 0x237   : > { %s1656_s16 = smov 128   ;;  %s1657_s23 = smov 8  }
 0x238   : > { %1495 = dma.vmem_to_hbm [thread:$0]  (%p1726_p5), %s1950_s17, 256, %s1948_s30, %s1952_s6, %s1656_s16, %s1656_s16, %s1657_s23  }
 0x239 PF: > { %p1501_p13 = scmp.ge.s32.totalorder %s1653_s21, 2  ;;  %s1124_s25 = sand.u32 1, %s1641_s18  }
 0x23a   : > { %s1125_s26 = scalar_lea.sflag [#allocation4], %s1124_s25 }
 0x23b   : > { %p1498_p0 = pnand %p1501_p13, %p1730_p6 }
 0x23d   : > { %p1499_p1 = pneg %p1498_p0 }
 0x23f   : > { %1636 = dma.done.wait (%p1499_p1), %s1125_s26, 256  }
 0x240   : > { %1638 = vsyncadd (%p1499_p1), %s1125_s26, 4294967040  ;;  %p15_p2 = scmp.ge.s32.totalorder %s1713_s24, 4   ;;  %s2006_s18 = smov %s1645_s19 }
 0x241   : > { %s2007_s19 = smov %s1649_s20  ;;  %s2008_s20 = smov %s1724_s27 }
 0x242   : > { %s2009_s21 = smov %s1713_s24  ;;  %17 = sbr.rel (!%p15_p2) target bundleno = 3 (0x3), region = 79 }
 0x247   :  { %1130 = vsyncpa [#allocation4], 1 }
 0x248   :  { %1132 = vsyncpa [#allocation4 + $0x1], 1 }

</bundles_post_ra>
